<compile_context>
chip_gen: v5e
topology: v5e:2x2
jax: 0.10.0
libtpu: 0.0.40
codegen_flags: <defaults>
</compile_context>

<pallas_src>
import functools
import math

import jax
import jax.numpy as jnp
from jax import lax
from jax.experimental import pallas as pl
from jax.experimental.pallas import tpu as pltpu


def _choose_q_tile(S):
    """Largest multiple-of-8 divisor of S (<=256) whose (TQ, S) f32 output
    tile stays around <=2 MiB per pipeline buffer."""
    if S % 8 != 0:
        return S
    budget_rows = max(8, (2 * 1024 * 1024) // (S * 4))
    tq = 8
    cand = 8
    while cand <= min(S, 256):
        if S % cand == 0 and cand <= budget_rows:
            tq = cand
        cand += 8
    return tq


def _choose_m_tile(M):
    """Row-tile for the projection kernel (divides M, multiple of 8)."""
    if M <= 512 or M % 8 != 0:
        return M
    tm = 8
    cand = 8
    while cand <= min(M, 512):
        if M % cand == 0:
            tm = cand
        cand += 8
    return tm


def qk_proj_kernel(xq_ref, xk_ref, wq_ref, bq_ref, wk_ref, bk_ref,
                   q_ref, k_ref, *, scale):
    # xq/xk tiles: (TM, D); per-head weights: (D, d_k); biases: (1, d_k).
    xq = xq_ref[...]
    xk = xk_ref[...]
    q = jnp.dot(xq, wq_ref[0], preferred_element_type=jnp.float32) + bq_ref[0]
    k = jnp.dot(xk, wk_ref[0], preferred_element_type=jnp.float32) + bk_ref[0]
    # Scale Q once here instead of scaling every (TQ, S) score tile later.
    q_ref[0] = (q * scale).astype(q_ref.dtype)
    k_ref[0] = k.astype(k_ref.dtype)


def attn_probs_kernel(q_ref, k_ref, out_ref):
    q = q_ref[0]          # (TQ, d_k), already scaled by 1/sqrt(d_k)
    k = k_ref[0]          # (S,  d_k)
    # Contract on the last dims of both operands -> no explicit K transpose.
    scores = lax.dot_general(q, k, (((1,), (1,)), ((), ())),
                             preferred_element_type=jnp.float32)   # (TQ, S)
    m = jnp.max(scores, axis=-1, keepdims=True)
    e = jnp.exp(scores - m)
    denom = jnp.sum(e, axis=-1, keepdims=True)
    # Approximate reciprocal runs on the EUP slot, freeing VALU cycles.
    p = e * pl.reciprocal(denom, approx=True)
    out_ref[0, 0] = p.astype(out_ref.dtype)


def multi_head_attention(xq, xk, wq, bq, wk, bk, *, h, qk_dtype=None):
    """Returns p_attn of shape (B, h, S, S), matching the PyTorch forward.

    qk_dtype: optional narrower dtype (e.g. jnp.bfloat16) for the projected
    Q/K fed to the QK^T MXU matmul (full-rate bf16 path on v6e/v7x); softmax
    math stays in f32 either way.
    """
    B, S, D = xq.shape
    assert D % h == 0
    d_k = D // h
    M = B * S
    qk_dtype = xq.dtype if qk_dtype is None else qk_dtype

    # Layout plumbing in the wrapper (tiny arrays): fold batch into M, and
    # present weights/biases as head-major slabs so head selection is pure DMA.
    xq2 = xq.reshape(M, D)
    xk2 = xk.reshape(M, D)
    wq_hm = wq.reshape(D, h, d_k).transpose(1, 0, 2)     # (H, D, d_k)
    wk_hm = wk.reshape(D, h, d_k).transpose(1, 0, 2)     # (H, D, d_k)
    bq_hm = bq.reshape(h, 1, d_k)                        # (H, 1, d_k)
    bk_hm = bk.reshape(h, 1, d_k)

    tm = _choose_m_tile(M)
    n_m = M // tm
    scale = 1.0 / math.sqrt(d_k)

    # ---- Stage 1: Q/K projections, head-major outputs, Q pre-scaled. ----
    q_hm, k_hm = pl.pallas_call(
        functools.partial(qk_proj_kernel, scale=scale),
        out_shape=(jax.ShapeDtypeStruct((h, M, d_k), qk_dtype),
                   jax.ShapeDtypeStruct((h, M, d_k), qk_dtype)),
        grid=(n_m, h),                       # h innermost -> x tile reused
        in_specs=[
            pl.BlockSpec((tm, D), lambda mi, hi: (mi, 0)),        # xq rows
            pl.BlockSpec((tm, D), lambda mi, hi: (mi, 0)),        # xk rows
            pl.BlockSpec((1, D, d_k), lambda mi, hi: (hi, 0, 0)),  # Wq head
            pl.BlockSpec((1, 1, d_k), lambda mi, hi: (hi, 0, 0)),  # bq head
            pl.BlockSpec((1, D, d_k), lambda mi, hi: (hi, 0, 0)),  # Wk head
            pl.BlockSpec((1, 1, d_k), lambda mi, hi: (hi, 0, 0)),  # bk head
        ],
        out_specs=(
            pl.BlockSpec((1, tm, d_k), lambda mi, hi: (hi, mi, 0)),
            pl.BlockSpec((1, tm, d_k), lambda mi, hi: (hi, mi, 0)),
        ),
        compiler_params=pltpu.CompilerParams(
            dimension_semantics=("parallel", "parallel")),
    )(xq2, xk2, wq_hm, bq_hm, wk_hm, bk_hm)

    # ---- Stage 2: per-(batch, head, q-tile) scores + softmax. ----
    tq = _choose_q_tile(S)
    n_q = S // tq

    attn = pl.pallas_call(
        attn_probs_kernel,
        out_shape=jax.ShapeDtypeStruct((B, h, S, S), jnp.float32),
        grid=(B, h, n_q),
        in_specs=[
            # Q tile for (b, h, qi): rows [b*S + qi*tq, ...) of head hi.
            pl.BlockSpec((1, tq, d_k), lambda b, hi, qi: (hi, b * n_q + qi, 0)),
            # Full K for (b, h); block index independent of qi -> reused.
            pl.BlockSpec((1, S, d_k), lambda b, hi, qi: (hi, b, 0)),
        ],
        out_specs=pl.BlockSpec((1, 1, tq, S),
                               lambda b, hi, qi: (b, hi, qi, 0)),
        compiler_params=pltpu.CompilerParams(
            dimension_semantics=("parallel", "parallel", "parallel")),
    )(q_hm, k_hm)
    return attn


def reference_mha(xq, xk, wq, bq, wk, bk, *, h):
    """Pure-JAX reference mirroring the PyTorch forward (eval mode, no mask)."""
    B, S, D = xq.shape
    d_k = D // h
    q = xq @ wq + bq
    k = xk @ wk + bk
    q = q.reshape(B, S, h, d_k).transpose(0, 2, 1, 3)    # (B, H, S, d_k)
    k = k.reshape(B, S, h, d_k).transpose(0, 2, 1, 3)
    scores = jnp.einsum("bhqd,bhkd->bhqk", q, k) / math.sqrt(d_k)
    return jax.nn.softmax(scores, axis=-1)


if __name__ == "__main__":
    # Small shapes consistent with the module: h=4, d_model=32, seq=8, batch=2.
    B, S, D, H = 2, 8, 32, 4

    key = jax.random.PRNGKey(0)
    k1, k2, k3, k4, k5, k6 = jax.random.split(key, 6)

    bound = 1.0 / math.sqrt(D)
    wq = jax.random.uniform(k1, (D, D), jnp.float32, -bound, bound)
    bq = jax.random.uniform(k2, (1, D), jnp.float32, -bound, bound)
    wk = jax.random.uniform(k3, (D, D), jnp.float32, -bound, bound)
    bk = jax.random.uniform(k4, (1, D), jnp.float32, -bound, bound)

    xq = jax.random.normal(k5, (B, S, D), jnp.float32)
    xk = jax.random.normal(k6, (B, S, D), jnp.float32)

    attn = multi_head_attention(xq, xk, wq, bq, wk, bk, h=H)
    attn = jax.block_until_ready(attn)

    ref = reference_mha(xq, xk, wq, bq, wk, bk, h=H)
    assert attn.shape == (B, H, S, S)
    # Tolerance relaxed vs exact division: softmax normalization uses the EUP
    # approximate reciprocal (error well below 1e-3 on probabilities <= 1).
    assert jnp.allclose(attn, ref, atol=1e-3, rtol=1e-3), "mismatch vs reference"

    print("KERNEL_OK")
</pallas_src>

<mosaic_0001>
module attributes {stable_mosaic.version = 11 : i64} {
  func.func @qk_proj_kernel(%arg0: i32, %arg1: i32, %arg2: memref<16x32xf32, #tpu.memory_space<vmem>>, %arg3: memref<16x32xf32, #tpu.memory_space<vmem>>, %arg4: memref<1x32x8xf32, #tpu.memory_space<vmem>>, %arg5: memref<1x1x8xf32, #tpu.memory_space<vmem>>, %arg6: memref<1x32x8xf32, #tpu.memory_space<vmem>>, %arg7: memref<1x1x8xf32, #tpu.memory_space<vmem>>, %arg8: memref<1x16x8xf32, #tpu.memory_space<vmem>>, %arg9: memref<1x16x8xf32, #tpu.memory_space<vmem>>) attributes {dimension_semantics = [#tpu.dimension_semantics<parallel>, #tpu.dimension_semantics<parallel>], iteration_bounds = array<i64: 1, 4>, scalar_prefetch = 0 : i64, scratch_operands = 0 : i64, tpu.core_type = #tpu.core_type<tc>, window_params = [{transform_indices = @transform_0, window_bounds = array<i64: 16, 32>}, {transform_indices = @transform_1, window_bounds = array<i64: 16, 32>}, {transform_indices = @transform_2, window_bounds = array<i64: 1, 32, 8>}, {transform_indices = @transform_3, window_bounds = array<i64: 1, 1, 8>}, {transform_indices = @transform_4, window_bounds = array<i64: 1, 32, 8>}, {transform_indices = @transform_5, window_bounds = array<i64: 1, 1, 8>}, {transform_indices = @transform_6, window_bounds = array<i64: 1, 16, 8>}, {transform_indices = @transform_7, window_bounds = array<i64: 1, 16, 8>}]} {
    %c0 = arith.constant 0 : index
    %c0_0 = arith.constant 0 : index
    %0 = vector.load %arg2[%c0, %c0_0] : memref<16x32xf32, #tpu.memory_space<vmem>>, vector<16x32xf32>
    %c0_1 = arith.constant 0 : index
    %c0_2 = arith.constant 0 : index
    %1 = vector.load %arg3[%c0_1, %c0_2] : memref<16x32xf32, #tpu.memory_space<vmem>>, vector<16x32xf32>
    %c0_3 = arith.constant 0 : index
    %c0_4 = arith.constant 0 : index
    %c0_5 = arith.constant 0 : index
    %2 = vector.load %arg4[%c0_3, %c0_4, %c0_5] : memref<1x32x8xf32, #tpu.memory_space<vmem>>, vector<1x32x8xf32>
    %3 = vector.shape_cast %2 : vector<1x32x8xf32> to vector<32x8xf32>
    %cst = arith.constant dense<0.000000e+00> : vector<16x8xf32>
    %4 = tpu.matmul %0, %3, %cst {dimension_numbers = #tpu.dot_dimension_numbers<[1], [0], [0], [1], [0, 0, 1, 1], [], []>} : vector<16x32xf32>, vector<32x8xf32>, vector<16x8xf32> -> vector<16x8xf32>
    %c0_6 = arith.constant 0 : index
    %c0_7 = arith.constant 0 : index
    %c0_8 = arith.constant 0 : index
    %5 = vector.load %arg5[%c0_6, %c0_7, %c0_8] : memref<1x1x8xf32, #tpu.memory_space<vmem>>, vector<1x1x8xf32>
    %6 = vector.shape_cast %5 : vector<1x1x8xf32> to vector<1x8xf32>
    %7 = vector.broadcast %6 : vector<1x8xf32> to vector<16x8xf32>
    %8 = arith.addf %4, %7 : vector<16x8xf32>
    %c0_9 = arith.constant 0 : index
    %c0_10 = arith.constant 0 : index
    %c0_11 = arith.constant 0 : index
    %9 = vector.load %arg6[%c0_9, %c0_10, %c0_11] : memref<1x32x8xf32, #tpu.memory_space<vmem>>, vector<1x32x8xf32>
    %10 = vector.shape_cast %9 : vector<1x32x8xf32> to vector<32x8xf32>
    %cst_12 = arith.constant dense<0.000000e+00> : vector<16x8xf32>
    %11 = tpu.matmul %1, %10, %cst_12 {dimension_numbers = #tpu.dot_dimension_numbers<[1], [0], [0], [1], [0, 0, 1, 1], [], []>} : vector<16x32xf32>, vector<32x8xf32>, vector<16x8xf32> -> vector<16x8xf32>
    %c0_13 = arith.constant 0 : index
    %c0_14 = arith.constant 0 : index
    %c0_15 = arith.constant 0 : index
    %12 = vector.load %arg7[%c0_13, %c0_14, %c0_15] : memref<1x1x8xf32, #tpu.memory_space<vmem>>, vector<1x1x8xf32>
    %13 = vector.shape_cast %12 : vector<1x1x8xf32> to vector<1x8xf32>
    %14 = vector.broadcast %13 : vector<1x8xf32> to vector<16x8xf32>
    %15 = arith.addf %11, %14 : vector<16x8xf32>
    %cst_16 = arith.constant 0.353553385 : f32
    %16 = vector.broadcast %cst_16 : f32 to vector<16x8xf32>
    %17 = arith.mulf %8, %16 : vector<16x8xf32>
    %c0_17 = arith.constant 0 : index
    %c0_18 = arith.constant 0 : index
    %c0_19 = arith.constant 0 : index
    %18 = vector.load %arg8[%c0_17, %c0_18, %c0_19] : memref<1x16x8xf32, #tpu.memory_space<vmem>>, vector<1x16x8xf32>
    %19 = vector.shape_cast %18 : vector<1x16x8xf32> to vector<16x8xf32>
    %20 = vector.shape_cast %17 : vector<16x8xf32> to vector<1x16x8xf32>
    tpu.vector_store %arg8[%c0_17, %c0_18, %c0_19], %20 {strides = array<i32>} : memref<1x16x8xf32, #tpu.memory_space<vmem>>, vector<1x16x8xf32>,
    %c0_20 = arith.constant 0 : index
    %c0_21 = arith.constant 0 : index
    %c0_22 = arith.constant 0 : index
    %21 = vector.load %arg9[%c0_20, %c0_21, %c0_22] : memref<1x16x8xf32, #tpu.memory_space<vmem>>, vector<1x16x8xf32>
    %22 = vector.shape_cast %21 : vector<1x16x8xf32> to vector<16x8xf32>
    %23 = vector.shape_cast %15 : vector<16x8xf32> to vector<1x16x8xf32>
    tpu.vector_store %arg9[%c0_20, %c0_21, %c0_22], %23 {strides = array<i32>} : memref<1x16x8xf32, #tpu.memory_space<vmem>>, vector<1x16x8xf32>,
    return
  }
  func.func @transform_0(%arg0: i32, %arg1: i32) -> (i32, i32) {
    %c0_i32 = arith.constant 0 : i32
    %c0_i32_0 = arith.constant 0 : i32
    return %arg0, %c0_i32 : i32, i32
  }
  func.func @transform_1(%arg0: i32, %arg1: i32) -> (i32, i32) {
    %c0_i32 = arith.constant 0 : i32
    %c0_i32_0 = arith.constant 0 : i32
    return %arg0, %c0_i32 : i32, i32
  }
  func.func @transform_2(%arg0: i32, %arg1: i32) -> (i32, i32, i32) {
    %c0_i32 = arith.constant 0 : i32
    %c0_i32_0 = arith.constant 0 : i32
    %c0_i32_1 = arith.constant 0 : i32
    return %arg1, %c0_i32, %c0_i32_0 : i32, i32, i32
  }
  func.func @transform_3(%arg0: i32, %arg1: i32) -> (i32, i32, i32) {
    %c0_i32 = arith.constant 0 : i32
    %c0_i32_0 = arith.constant 0 : i32
    %c0_i32_1 = arith.constant 0 : i32
    return %arg1, %c0_i32, %c0_i32_0 : i32, i32, i32
  }
  func.func @transform_4(%arg0: i32, %arg1: i32) -> (i32, i32, i32) {
    %c0_i32 = arith.constant 0 : i32
    %c0_i32_0 = arith.constant 0 : i32
    %c0_i32_1 = arith.constant 0 : i32
    return %arg1, %c0_i32, %c0_i32_0 : i32, i32, i32
  }
  func.func @transform_5(%arg0: i32, %arg1: i32) -> (i32, i32, i32) {
    %c0_i32 = arith.constant 0 : i32
    %c0_i32_0 = arith.constant 0 : i32
    %c0_i32_1 = arith.constant 0 : i32
    return %arg1, %c0_i32, %c0_i32_0 : i32, i32, i32
  }
  func.func @transform_6(%arg0: i32, %arg1: i32) -> (i32, i32, i32) {
    %c0_i32 = arith.constant 0 : i32
    %c0_i32_0 = arith.constant 0 : i32
    return %arg1, %arg0, %c0_i32 : i32, i32, i32
  }
  func.func @transform_7(%arg0: i32, %arg1: i32) -> (i32, i32, i32) {
    %c0_i32 = arith.constant 0 : i32
    %c0_i32_0 = arith.constant 0 : i32
    return %arg1, %arg0, %c0_i32 : i32, i32, i32
  }
}

</mosaic_0001>

<bundles_post_ra>
// kernel: tpu_custom_call.1
= control target key start
LH: loop header
LB: loop body
LE: loop exit
PB: predicated region body
PF: predicated region fallthrough
CT: control target
= control target key end

     0   :  { %s818_s24 = smov 0   ;;  %s820_s25 = smov 0   ;;  %s886_s0 = inlined_call_operand.vmem [shape: f32[16,32], index: 0, kind: input, shape index: {}]   ;;  %s887_s1 = inlined_call_operand.vmem [shape: f32[16,32], index: 1, kind: input, shape index: {}]   ;;  %s888_s2 = inlined_call_operand.vmem [shape: f32[4,32,8], index: 2, kind: input, shape index: {}]   ;;  %s889_s3 = inlined_call_operand.vmem [shape: f32[4,1,8], index: 3, kind: input, shape index: {}]   ;;  %s890_s4 = inlined_call_operand.vmem [shape: f32[4,32,8], index: 4, kind: input, shape index: {}]   ;;  %s891_s5 = inlined_call_operand.vmem [shape: f32[4,1,8], index: 5, kind: input, shape index: {}]   ;;  %s892_s6 = inlined_call_operand.vmem [shape: f32[4,16,8], index: 6, kind: output, shape index: {0}]   ;;  %s893_s7 = inlined_call_operand.vmem [shape: f32[4,16,8], index: 7, kind: output, shape index: {1}]  }
   0x1   :  { %s822_s26 = smov 0  }
   0x2 LB: > { %s27_s27 = sadd.s32 1, %s772_s25  ;;  %p701_p0 = scmp.ge.s32.totalorder %s776_s26, 1  ;;  %s776_s26 = sphi %s822_s26, %s18_s26   ;;  %s772_s25 = sphi %s820_s25, %s895_s25   ;;  %s768_s24 = sphi %s818_s24, %s894_s24  }
   0x3   : > { %p28_p1 = scmp.ge.s32.totalorder %s27_s27, 4  ;;  %p304_p2 = scmp.lt.s32.totalorder %s776_s26, 5 }
   0x5   : > { %s897_s27 = smov (%p28_p1, %s27_s27), 0  ;;  %p305_p3 = pnand %p701_p0, %p304_p2 }
   0x6   : > { %p382_p4 = scmp.lt.s32.totalorder (!%p305_p3), %s768_s24, 3 }
   0x7   : > { %308 = sbr.rel (%p305_p3) target bundleno = 160 (0xa0), region = 44 }
   0xc   : > { %s899_s24 = smov (!%p382_p4, %s768_s24), 3  ;;  %v419_v8 = vld [vmem:[%s886_s0 + $0x8] sm:$0xff]  ;;  %vm430_vm0 = vcmask 261120   ;;  %v418_v10 = vld [vmem:[%s886_s0] sm:$0xff]  ;;  %vm499_vm1 = vcmask 64512  }
   0xd   : > { %s716_s28 = sshll.u32 %s899_s24, 5  ;;  %s389_s8 = scalar_lea.vmem %s889_s3, %s899_s24  ;;  %v421_v9 = vld [vmem:[%s887_s1 + $0x8] sm:$0xff]  ;;  %v420_v11 = vld [vmem:[%s887_s1] sm:$0xff] }
   0xe   : > { %s386_s11 = scalar_lea.vmem %s888_s2, %s716_s28  ;;  %s394_s14 = scalar_lea.vmem %s890_s4, %s716_s28  ;;  %v752_v12 = vld [vmem:[%s389_s8] ss:$0 sm:$0xff] }
   0xf   : > { %v425_v0 = vld [vmem:[%s386_s11 + $0x18] sm:$0xff]  ;;  %v424_v1 = vld [vmem:[%s386_s11 + $0x10] sm:$0xff]  ;;  %v423_v4 = vld [vmem:[%s386_s11 + $0x8] sm:$0xff]  ;;  %s397_s29 = scalar_lea.vmem %s891_s5, %s899_s24  ;;  %s718_s30 = sshll.u32 %s899_s24, 4 }
  0x10   : > { %v463_v2 = vld [vmem:[%s394_s14 + $0x18] sm:$0xff]  ;;  %720 = vmatpush.msra.mxu2 %v425_v0  ;;  %v462_v3 = vld [vmem:[%s394_s14 + $0x10] sm:$0xff]  ;;  %449 = vmatpush.msra.mxu0 %v425_v0  ;;  %v461_v5 = vld [vmem:[%s394_s14 + $0x8] sm:$0xff]  ;;  %s416_s13 = scalar_lea.vmem %s893_s7, %s718_s30  ;;  %s406_s16 = scalar_lea.vmem %s892_s6, %s718_s30 }
  0x11   : > { %724 = vmatpush.msra.mxu3 %v463_v2  ;;  %486 = vmatpush.msra.mxu1 %v463_v2  ;;  %v422_v6 = vld [vmem:[%s386_s11] sm:$0xff] }
  0x12   : > { %721 = vmatpush.msra.mxu2 %v424_v1  ;;  %450 = vmatpush.msra.mxu0 %v424_v1  ;;  %v460_v7 = vld [vmem:[%s394_s14] sm:$0xff] }
  0x13   : > { %725 = vmatpush.msra.mxu3 %v462_v3  ;;  %487 = vmatpush.msra.mxu1 %v462_v3  ;;  %v753_v13 = vld [vmem:[%s397_s29] ss:$0 sm:$0xff] }
  0x14   : > { %722 = vmatpush.msra.mxu2 %v423_v4  ;;  %451 = vmatpush.msra.mxu0 %v423_v4 }
  0x15   : > { %726 = vmatpush.msra.mxu3 %v461_v5  ;;  %488 = vmatpush.msra.mxu1 %v461_v5 }
  0x16   : > { %723 = vmatpush.msra.mxu2 %v422_v6  ;;  %452 = vmatpush.msra.mxu0 %v422_v6 }
  0x17   : > { %727 = vmatpush.msra.mxu3 %v460_v7  ;;  %711 = vmatmul.msk.f32.vlgmr.msra.gmra.mxu2 %vm430_vm0, %v419_v8 }
  0x18   : > { %713 = vmatmul.msk.f32.vlgmr.msra.gmra.mxu3 %vm430_vm0, %v421_v9  ;;  %489 = vmatpush.msra.mxu1 %v460_v7 }
  0x19   : > { %710 = vmatmul.msk.f32.vlgmr.msra.gmra.mxu0 %vm430_vm0, %v418_v10  ;;  %712 = vmatmul.msk.f32.vlgmr.msra.gmra.mxu1 %vm430_vm0, %v420_v11 }
  0x96   : > { %v454_v14 = vpop.f32.mrf.mxu0  ;;  %v491_v15 = vpop.f32.mrf.mxu1 }
  0x97   : > { %v455_v16 = vadd.f32 %v752_v12, %v454_v14  ;;  %v492_v17 = vadd.f32 %v753_v13, %v491_v15 }
  0x99   : > { %v497_v18 = vmul.f32 0.35355338, %v455_v16  ;;  %502 = vst.msk [vmem:[%s416_s13] sm:$0xff] %vm499_vm1, %v492_v17 }
  0x9a   : > { %v457_v19 = vpop.f32.mrf.mxu2 }
  0x9b   : > { %v494_v20 = vpop.f32.mrf.mxu3  ;;  %500 = vst.msk [vmem:[%s406_s16] sm:$0xff] %vm499_vm1, %v497_v18  ;;  %v458_v21 = vadd.f32 %v752_v12, %v457_v19 }
  0x9c   : > { %v495_v22 = vadd.f32 %v753_v13, %v494_v20 }
  0x9d   : > { %v498_v23 = vmul.f32 0.35355338, %v458_v21 }
  0x9e   : > { %503 = vst.msk [vmem:[%s416_s13 + $0x8] sm:$0xff] %vm499_vm1, %v495_v22 }
  0x9f   : > { %501 = vst.msk [vmem:[%s406_s16 + $0x8] sm:$0xff] %vm499_vm1, %v498_v23 }
  0xa0 PF: > { %s18_s26 = sadd.s32 1, %s776_s26   ;;  %s894_s24 = smov %s772_s25 }
  0xa1   : > { %p15_p5 = scmp.ge.s32.totalorder %s18_s26, 6   ;;  %s895_s25 = smov %s897_s27 }
  0xa3   :  { %17 = sbr.rel (!%p15_p5) target bundleno = 2 (0x2), region = 101 }

</bundles_post_ra>
